<compile_context>
chip_gen: v7x
topology: tpu7x:2x2x1
jax: 0.10.0
libtpu: 0.0.40
codegen_flags: <defaults>
</compile_context>

<pallas_src>
import jax
import jax.numpy as jnp
from jax.experimental import pallas as pl
from jax.experimental.pallas import tpu as pltpu

NUM_LAYERS = 10                       # ParameterNet(num_layers=10, hidden_neurons=32)
HIDDEN = 32
NUM_HIDDEN_BLOCKS = NUM_LAYERS - 1    # 9 x (Linear(32,32) + ReLU) after the first layer
TM = 256                              # batch tile (lane axis), multiple of 256


def _param_net_kernel(t_ref, w0_ref, b0_ref, wh_ref, bh_ref, wo_ref, bo_ref, out_ref):
    # t_ref: (1, TM)  -- batch on lanes.
    t = t_ref[...]

    # First layer Linear(1, 32) + ReLU as an outer product on the VPU:
    # (32, 1) * (1, TM) + (32, 1)  ->  (32, TM)
    h = jnp.maximum(w0_ref[...] * t + b0_ref[...], 0.0)

    # 9 x (Linear(32,32) + ReLU): h <- relu(W @ h + b), statically unrolled.
    for i in range(NUM_HIDDEN_BLOCKS):
        h = jnp.dot(wh_ref[i], h, preferred_element_type=jnp.float32) + bh_ref[i]
        h = jnp.maximum(h, 0.0)

    # Output layer Linear(32, 3) + sigmoid, emitted lane-dense as (3, TM).
    p = jnp.dot(wo_ref[...], h, preferred_element_type=jnp.float32) + bo_ref[...]
    out_ref[...] = jax.nn.sigmoid(p)


@jax.jit
def param_net_forward(t, w0, b0, wh, bh, wo, bo):
    """t: (N, 1) float32 -> (beta, gamma, delta), each (N,) float32."""
    n = t.shape[0]
    # >= 2 grid steps so v7x's two TensorCores both get work; waste is one spare tile.
    n_blocks = max(2, pl.cdiv(n, TM))
    n_pad = n_blocks * TM

    # Feature-major input: (1, n_pad), batch on the lane axis.
    t_fm = jnp.pad(t.astype(jnp.float32).T, ((0, 0), (0, n_pad - n)))

    out = pl.pallas_call(
        _param_net_kernel,
        out_shape=jax.ShapeDtypeStruct((3, n_pad), jnp.float32),
        grid_spec=pltpu.PrefetchScalarGridSpec(
            num_scalar_prefetch=0,
            grid=(n_blocks,),
            in_specs=[
                pl.BlockSpec((1, TM), lambda i: (0, i)),                       # t tile
                pl.BlockSpec((HIDDEN, 1), lambda i: (0, 0)),                   # W0 (32,1)
                pl.BlockSpec((HIDDEN, 1), lambda i: (0, 0)),                   # b0 (32,1)
                pl.BlockSpec((NUM_HIDDEN_BLOCKS, HIDDEN, HIDDEN),
                             lambda i: (0, 0, 0)),                             # W_hidden stack
                pl.BlockSpec((NUM_HIDDEN_BLOCKS, HIDDEN, 1),
                             lambda i: (0, 0, 0)),                             # b_hidden stack
                pl.BlockSpec((3, HIDDEN), lambda i: (0, 0)),                   # W_out (3,32)
                pl.BlockSpec((3, 1), lambda i: (0, 0)),                        # b_out (3,1)
            ],
            out_specs=pl.BlockSpec((3, TM), lambda i: (0, i)),                 # lane-dense out
        ),
        compiler_params=pltpu.CompilerParams(
            dimension_semantics=("parallel",)),
    )(t_fm, w0, b0, wh, bh, wo, bo)

    out = out[:, :n]                   # (3, N), contiguous row slices
    return out[0], out[1], out[2]      # beta, gamma, delta


def init_params(key):
    """Xavier-uniform with gain=sqrt(2) (relu gain), biases = 0.001 — mirrors init_xavier.

    Weights are stored PyTorch-style (out_features, in_features) so the feature-major
    kernel computes h_new = W @ h directly (no transposes anywhere).
    """
    gain = jnp.sqrt(2.0)

    def xavier(k, fan_in, fan_out):
        bound = gain * jnp.sqrt(6.0 / (fan_in + fan_out))
        return jax.random.uniform(k, (fan_out, fan_in), jnp.float32, -bound, bound)

    keys = jax.random.split(key, 2 + NUM_HIDDEN_BLOCKS)
    w0 = xavier(keys[0], 1, HIDDEN)                                   # (32, 1)
    b0 = jnp.full((HIDDEN, 1), 0.001, jnp.float32)
    wh = jnp.stack([xavier(keys[1 + i], HIDDEN, HIDDEN)
                    for i in range(NUM_HIDDEN_BLOCKS)])               # (9, 32, 32)
    bh = jnp.full((NUM_HIDDEN_BLOCKS, HIDDEN, 1), 0.001, jnp.float32)
    wo = xavier(keys[-1], HIDDEN, 3)                                  # (3, 32)
    bo = jnp.full((3, 1), 0.001, jnp.float32)
    return w0, b0, wh, bh, wo, bo


def _reference_forward(t, w0, b0, wh, bh, wo, bo):
    x = t.T                                                  # (1, N)
    h = jnp.maximum(w0 @ x + b0, 0.0)                        # (32, N)
    for i in range(NUM_HIDDEN_BLOCKS):
        h = jnp.maximum(wh[i] @ h + bh[i], 0.0)
    s = jax.nn.sigmoid(wo @ h + bo)                          # (3, N)
    return s[0], s[1], s[2]


if __name__ == "__main__":
    key = jax.random.PRNGKey(0)
    params = init_params(key)

    # t_total = arange(len(data)) -> float column vector, like the PyTorch driver code.
    N = 200
    t = jnp.arange(N, dtype=jnp.float32).reshape(-1, 1)

    beta, gamma, delta = param_net_forward(t, *params)
    jax.block_until_ready((beta, gamma, delta))

    # Sanity check against a pure-JAX reference.
    rb, rg, rd = _reference_forward(t, *params)
    assert beta.shape == (N,) and gamma.shape == (N,) and delta.shape == (N,)
    assert jnp.allclose(beta, rb, atol=2e-5)
    assert jnp.allclose(gamma, rg, atol=2e-5)
    assert jnp.allclose(delta, rd, atol=2e-5)

    print("KERNEL_OK")
</pallas_src>

<mosaic_0001>
module attributes {stable_mosaic.version = 11 : i64} {
  func.func @_param_net_kernel(%arg0: i32, %arg1: memref<1x256xf32, #tpu.memory_space<vmem>>, %arg2: memref<32x1xf32, #tpu.memory_space<vmem>>, %arg3: memref<32x1xf32, #tpu.memory_space<vmem>>, %arg4: memref<9x32x32xf32, #tpu.memory_space<vmem>>, %arg5: memref<9x32x1xf32, #tpu.memory_space<vmem>>, %arg6: memref<3x32xf32, #tpu.memory_space<vmem>>, %arg7: memref<3x1xf32, #tpu.memory_space<vmem>>, %arg8: memref<3x256xf32, #tpu.memory_space<vmem>>) attributes {dimension_semantics = [#tpu.dimension_semantics<parallel>], iteration_bounds = array<i64: 2>, scalar_prefetch = 0 : i64, scratch_operands = 0 : i64, tpu.core_type = #tpu.core_type<tc>, window_params = [{transform_indices = @transform_0, window_bounds = array<i64: 1, 256>}, {pipeline_mode = #tpu.pipeline_mode<synchronous>, transform_indices = @transform_1, window_bounds = array<i64: 32, 1>}, {pipeline_mode = #tpu.pipeline_mode<synchronous>, transform_indices = @transform_2, window_bounds = array<i64: 32, 1>}, {pipeline_mode = #tpu.pipeline_mode<synchronous>, transform_indices = @transform_3, window_bounds = array<i64: 9, 32, 32>}, {pipeline_mode = #tpu.pipeline_mode<synchronous>, transform_indices = @transform_4, window_bounds = array<i64: 9, 32, 1>}, {pipeline_mode = #tpu.pipeline_mode<synchronous>, transform_indices = @transform_5, window_bounds = array<i64: 3, 32>}, {pipeline_mode = #tpu.pipeline_mode<synchronous>, transform_indices = @transform_6, window_bounds = array<i64: 3, 1>}, {transform_indices = @transform_7, window_bounds = array<i64: 3, 256>}]} {
    %c0 = arith.constant 0 : index
    %c0_0 = arith.constant 0 : index
    %0 = vector.load %arg1[%c0, %c0_0] : memref<1x256xf32, #tpu.memory_space<vmem>>, vector<1x256xf32>
    %c0_1 = arith.constant 0 : index
    %c0_2 = arith.constant 0 : index
    %1 = vector.load %arg2[%c0_1, %c0_2] : memref<32x1xf32, #tpu.memory_space<vmem>>, vector<32x1xf32>
    %2 = vector.broadcast %1 : vector<32x1xf32> to vector<32x256xf32>
    %3 = vector.broadcast %0 : vector<1x256xf32> to vector<32x256xf32>
    %4 = arith.mulf %2, %3 : vector<32x256xf32>
    %c0_3 = arith.constant 0 : index
    %c0_4 = arith.constant 0 : index
    %5 = vector.load %arg3[%c0_3, %c0_4] : memref<32x1xf32, #tpu.memory_space<vmem>>, vector<32x1xf32>
    %6 = vector.broadcast %5 : vector<32x1xf32> to vector<32x256xf32>
    %7 = arith.addf %4, %6 : vector<32x256xf32>
    %cst = arith.constant 0.000000e+00 : f32
    %8 = vector.broadcast %cst : f32 to vector<32x256xf32>
    %9 = arith.maximumf %7, %8 : vector<32x256xf32>
    %c0_5 = arith.constant 0 : index
    %c0_6 = arith.constant 0 : index
    %c0_7 = arith.constant 0 : index
    %10 = vector.load %arg4[%c0_5, %c0_6, %c0_7] : memref<9x32x32xf32, #tpu.memory_space<vmem>>, vector<1x32x32xf32>
    %11 = vector.shape_cast %10 : vector<1x32x32xf32> to vector<32x32xf32>
    %cst_8 = arith.constant dense<0.000000e+00> : vector<32x256xf32>
    %12 = tpu.matmul %11, %9, %cst_8 {dimension_numbers = #tpu.dot_dimension_numbers<[1], [0], [0], [1], [0, 0, 1, 1], [], []>} : vector<32x32xf32>, vector<32x256xf32>, vector<32x256xf32> -> vector<32x256xf32>
    %c0_9 = arith.constant 0 : index
    %c0_10 = arith.constant 0 : index
    %c0_11 = arith.constant 0 : index
    %13 = vector.load %arg5[%c0_9, %c0_10, %c0_11] : memref<9x32x1xf32, #tpu.memory_space<vmem>>, vector<1x32x1xf32>
    %14 = vector.shape_cast %13 : vector<1x32x1xf32> to vector<32x1xf32>
    %15 = vector.broadcast %14 : vector<32x1xf32> to vector<32x256xf32>
    %16 = arith.addf %12, %15 : vector<32x256xf32>
    %cst_12 = arith.constant 0.000000e+00 : f32
    %17 = vector.broadcast %cst_12 : f32 to vector<32x256xf32>
    %18 = arith.maximumf %16, %17 : vector<32x256xf32>
    %c1 = arith.constant 1 : index
    %c0_13 = arith.constant 0 : index
    %c0_14 = arith.constant 0 : index
    %19 = vector.load %arg4[%c1, %c0_13, %c0_14] : memref<9x32x32xf32, #tpu.memory_space<vmem>>, vector<1x32x32xf32>
    %20 = vector.shape_cast %19 : vector<1x32x32xf32> to vector<32x32xf32>
    %cst_15 = arith.constant dense<0.000000e+00> : vector<32x256xf32>
    %21 = tpu.matmul %20, %18, %cst_15 {dimension_numbers = #tpu.dot_dimension_numbers<[1], [0], [0], [1], [0, 0, 1, 1], [], []>} : vector<32x32xf32>, vector<32x256xf32>, vector<32x256xf32> -> vector<32x256xf32>
    %c1_16 = arith.constant 1 : index
    %c0_17 = arith.constant 0 : index
    %c0_18 = arith.constant 0 : index
    %22 = vector.load %arg5[%c1_16, %c0_17, %c0_18] : memref<9x32x1xf32, #tpu.memory_space<vmem>>, vector<1x32x1xf32>
    %23 = vector.shape_cast %22 : vector<1x32x1xf32> to vector<32x1xf32>
    %24 = vector.broadcast %23 : vector<32x1xf32> to vector<32x256xf32>
    %25 = arith.addf %21, %24 : vector<32x256xf32>
    %cst_19 = arith.constant 0.000000e+00 : f32
    %26 = vector.broadcast %cst_19 : f32 to vector<32x256xf32>
    %27 = arith.maximumf %25, %26 : vector<32x256xf32>
    %c2 = arith.constant 2 : index
    %c0_20 = arith.constant 0 : index
    %c0_21 = arith.constant 0 : index
    %28 = vector.load %arg4[%c2, %c0_20, %c0_21] : memref<9x32x32xf32, #tpu.memory_space<vmem>>, vector<1x32x32xf32>
    %29 = vector.shape_cast %28 : vector<1x32x32xf32> to vector<32x32xf32>
    %cst_22 = arith.constant dense<0.000000e+00> : vector<32x256xf32>
    %30 = tpu.matmul %29, %27, %cst_22 {dimension_numbers = #tpu.dot_dimension_numbers<[1], [0], [0], [1], [0, 0, 1, 1], [], []>} : vector<32x32xf32>, vector<32x256xf32>, vector<32x256xf32> -> vector<32x256xf32>
    %c2_23 = arith.constant 2 : index
    %c0_24 = arith.constant 0 : index
    %c0_25 = arith.constant 0 : index
    %31 = vector.load %arg5[%c2_23, %c0_24, %c0_25] : memref<9x32x1xf32, #tpu.memory_space<vmem>>, vector<1x32x1xf32>
    %32 = vector.shape_cast %31 : vector<1x32x1xf32> to vector<32x1xf32>
    %33 = vector.broadcast %32 : vector<32x1xf32> to vector<32x256xf32>
    %34 = arith.addf %30, %33 : vector<32x256xf32>
    %cst_26 = arith.constant 0.000000e+00 : f32
    %35 = vector.broadcast %cst_26 : f32 to vector<32x256xf32>
    %36 = arith.maximumf %34, %35 : vector<32x256xf32>
    %c3 = arith.constant 3 : index
    %c0_27 = arith.constant 0 : index
    %c0_28 = arith.constant 0 : index
    %37 = vector.load %arg4[%c3, %c0_27, %c0_28] : memref<9x32x32xf32, #tpu.memory_space<vmem>>, vector<1x32x32xf32>
    %38 = vector.shape_cast %37 : vector<1x32x32xf32> to vector<32x32xf32>
    %cst_29 = arith.constant dense<0.000000e+00> : vector<32x256xf32>
    %39 = tpu.matmul %38, %36, %cst_29 {dimension_numbers = #tpu.dot_dimension_numbers<[1], [0], [0], [1], [0, 0, 1, 1], [], []>} : vector<32x32xf32>, vector<32x256xf32>, vector<32x256xf32> -> vector<32x256xf32>
    %c3_30 = arith.constant 3 : index
    %c0_31 = arith.constant 0 : index
    %c0_32 = arith.constant 0 : index
    %40 = vector.load %arg5[%c3_30, %c0_31, %c0_32] : memref<9x32x1xf32, #tpu.memory_space<vmem>>, vector<1x32x1xf32>
    %41 = vector.shape_cast %40 : vector<1x32x1xf32> to vector<32x1xf32>
    %42 = vector.broadcast %41 : vector<32x1xf32> to vector<32x256xf32>
    %43 = arith.addf %39, %42 : vector<32x256xf32>
    %cst_33 = arith.constant 0.000000e+00 : f32
    %44 = vector.broadcast %cst_33 : f32 to vector<32x256xf32>
    %45 = arith.maximumf %43, %44 : vector<32x256xf32>
    %c4 = arith.constant 4 : index
    %c0_34 = arith.constant 0 : index
    %c0_35 = arith.constant 0 : index
    %46 = vector.load %arg4[%c4, %c0_34, %c0_35] : memref<9x32x32xf32, #tpu.memory_space<vmem>>, vector<1x32x32xf32>
    %47 = vector.shape_cast %46 : vector<1x32x32xf32> to vector<32x32xf32>
    %cst_36 = arith.constant dense<0.000000e+00> : vector<32x256xf32>
    %48 = tpu.matmul %47, %45, %cst_36 {dimension_numbers = #tpu.dot_dimension_numbers<[1], [0], [0], [1], [0, 0, 1, 1], [], []>} : vector<32x32xf32>, vector<32x256xf32>, vector<32x256xf32> -> vector<32x256xf32>
    %c4_37 = arith.constant 4 : index
    %c0_38 = arith.constant 0 : index
    %c0_39 = arith.constant 0 : index
    %49 = vector.load %arg5[%c4_37, %c0_38, %c0_39] : memref<9x32x1xf32, #tpu.memory_space<vmem>>, vector<1x32x1xf32>
    %50 = vector.shape_cast %49 : vector<1x32x1xf32> to vector<32x1xf32>
    %51 = vector.broadcast %50 : vector<32x1xf32> to vector<32x256xf32>
    %52 = arith.addf %48, %51 : vector<32x256xf32>
    %cst_40 = arith.constant 0.000000e+00 : f32
    %53 = vector.broadcast %cst_40 : f32 to vector<32x256xf32>
    %54 = arith.maximumf %52, %53 : vector<32x256xf32>
    %c5 = arith.constant 5 : index
    %c0_41 = arith.constant 0 : index
    %c0_42 = arith.constant 0 : index
    %55 = vector.load %arg4[%c5, %c0_41, %c0_42] : memref<9x32x32xf32, #tpu.memory_space<vmem>>, vector<1x32x32xf32>
    %56 = vector.shape_cast %55 : vector<1x32x32xf32> to vector<32x32xf32>
    %cst_43 = arith.constant dense<0.000000e+00> : vector<32x256xf32>
    %57 = tpu.matmul %56, %54, %cst_43 {dimension_numbers = #tpu.dot_dimension_numbers<[1], [0], [0], [1], [0, 0, 1, 1], [], []>} : vector<32x32xf32>, vector<32x256xf32>, vector<32x256xf32> -> vector<32x256xf32>
    %c5_44 = arith.constant 5 : index
    %c0_45 = arith.constant 0 : index
    %c0_46 = arith.constant 0 : index
    %58 = vector.load %arg5[%c5_44, %c0_45, %c0_46] : memref<9x32x1xf32, #tpu.memory_space<vmem>>, vector<1x32x1xf32>
    %59 = vector.shape_cast %58 : vector<1x32x1xf32> to vector<32x1xf32>
    %60 = vector.broadcast %59 : vector<32x1xf32> to vector<32x256xf32>
    %61 = arith.addf %57, %60 : vector<32x256xf32>
    %cst_47 = arith.constant 0.000000e+00 : f32
    %62 = vector.broadcast %cst_47 : f32 to vector<32x256xf32>
    %63 = arith.maximumf %61, %62 : vector<32x256xf32>
    %c6 = arith.constant 6 : index
    %c0_48 = arith.constant 0 : index
    %c0_49 = arith.constant 0 : index
    %64 = vector.load %arg4[%c6, %c0_48, %c0_49] : memref<9x32x32xf32, #tpu.memory_space<vmem>>, vector<1x32x32xf32>
    %65 = vector.shape_cast %64 : vector<1x32x32xf32> to vector<32x32xf32>
    %cst_50 = arith.constant dense<0.000000e+00> : vector<32x256xf32>
    %66 = tpu.matmul %65, %63, %cst_50 {dimension_numbers = #tpu.dot_dimension_numbers<[1], [0], [0], [1], [0, 0, 1, 1], [], []>} : vector<32x32xf32>, vector<32x256xf32>, vector<32x256xf32> -> vector<32x256xf32>
    %c6_51 = arith.constant 6 : index
    %c0_52 = arith.constant 0 : index
    %c0_53 = arith.constant 0 : index
    %67 = vector.load %arg5[%c6_51, %c0_52, %c0_53] : memref<9x32x1xf32, #tpu.memory_space<vmem>>, vector<1x32x1xf32>
    %68 = vector.shape_cast %67 : vector<1x32x1xf32> to vector<32x1xf32>
    %69 = vector.broadcast %68 : vector<32x1xf32> to vector<32x256xf32>
    %70 = arith.addf %66, %69 : vector<32x256xf32>
    %cst_54 = arith.constant 0.000000e+00 : f32
    %71 = vector.broadcast %cst_54 : f32 to vector<32x256xf32>
    %72 = arith.maximumf %70, %71 : vector<32x256xf32>
    %c7 = arith.constant 7 : index
    %c0_55 = arith.constant 0 : index
    %c0_56 = arith.constant 0 : index
    %73 = vector.load %arg4[%c7, %c0_55, %c0_56] : memref<9x32x32xf32, #tpu.memory_space<vmem>>, vector<1x32x32xf32>
    %74 = vector.shape_cast %73 : vector<1x32x32xf32> to vector<32x32xf32>
    %cst_57 = arith.constant dense<0.000000e+00> : vector<32x256xf32>
    %75 = tpu.matmul %74, %72, %cst_57 {dimension_numbers = #tpu.dot_dimension_numbers<[1], [0], [0], [1], [0, 0, 1, 1], [], []>} : vector<32x32xf32>, vector<32x256xf32>, vector<32x256xf32> -> vector<32x256xf32>
    %c7_58 = arith.constant 7 : index
    %c0_59 = arith.constant 0 : index
    %c0_60 = arith.constant 0 : index
    %76 = vector.load %arg5[%c7_58, %c0_59, %c0_60] : memref<9x32x1xf32, #tpu.memory_space<vmem>>, vector<1x32x1xf32>
    %77 = vector.shape_cast %76 : vector<1x32x1xf32> to vector<32x1xf32>
    %78 = vector.broadcast %77 : vector<32x1xf32> to vector<32x256xf32>
    %79 = arith.addf %75, %78 : vector<32x256xf32>
    %cst_61 = arith.constant 0.000000e+00 : f32
    %80 = vector.broadcast %cst_61 : f32 to vector<32x256xf32>
    %81 = arith.maximumf %79, %80 : vector<32x256xf32>
    %c8 = arith.constant 8 : index
    %c0_62 = arith.constant 0 : index
    %c0_63 = arith.constant 0 : index
    %82 = vector.load %arg4[%c8, %c0_62, %c0_63] : memref<9x32x32xf32, #tpu.memory_space<vmem>>, vector<1x32x32xf32>
    %83 = vector.shape_cast %82 : vector<1x32x32xf32> to vector<32x32xf32>
    %cst_64 = arith.constant dense<0.000000e+00> : vector<32x256xf32>
    %84 = tpu.matmul %83, %81, %cst_64 {dimension_numbers = #tpu.dot_dimension_numbers<[1], [0], [0], [1], [0, 0, 1, 1], [], []>} : vector<32x32xf32>, vector<32x256xf32>, vector<32x256xf32> -> vector<32x256xf32>
    %c8_65 = arith.constant 8 : index
    %c0_66 = arith.constant 0 : index
    %c0_67 = arith.constant 0 : index
    %85 = vector.load %arg5[%c8_65, %c0_66, %c0_67] : memref<9x32x1xf32, #tpu.memory_space<vmem>>, vector<1x32x1xf32>
    %86 = vector.shape_cast %85 : vector<1x32x1xf32> to vector<32x1xf32>
    %87 = vector.broadcast %86 : vector<32x1xf32> to vector<32x256xf32>
    %88 = arith.addf %84, %87 : vector<32x256xf32>
    %cst_68 = arith.constant 0.000000e+00 : f32
    %89 = vector.broadcast %cst_68 : f32 to vector<32x256xf32>
    %90 = arith.maximumf %88, %89 : vector<32x256xf32>
    %c0_69 = arith.constant 0 : index
    %c0_70 = arith.constant 0 : index
    %91 = vector.load %arg6[%c0_69, %c0_70] : memref<3x32xf32, #tpu.memory_space<vmem>>, vector<3x32xf32>
    %cst_71 = arith.constant dense<0.000000e+00> : vector<3x256xf32>
    %92 = tpu.matmul %91, %90, %cst_71 {dimension_numbers = #tpu.dot_dimension_numbers<[1], [0], [0], [1], [0, 0, 1, 1], [], []>} : vector<3x32xf32>, vector<32x256xf32>, vector<3x256xf32> -> vector<3x256xf32>
    %c0_72 = arith.constant 0 : index
    %c0_73 = arith.constant 0 : index
    %93 = vector.load %arg7[%c0_72, %c0_73] : memref<3x1xf32, #tpu.memory_space<vmem>>, vector<3x1xf32>
    %94 = vector.broadcast %93 : vector<3x1xf32> to vector<3x256xf32>
    %95 = arith.addf %92, %94 : vector<3x256xf32>
    %96 = arith.negf %95 : vector<3x256xf32>
    %97 = math.exp %96 : vector<3x256xf32>
    %cst_74 = arith.constant 1.000000e+00 : f32
    %98 = vector.broadcast %cst_74 : f32 to vector<3x256xf32>
    %99 = arith.addf %98, %97 : vector<3x256xf32>
    %100 = arith.divf %98, %99 : vector<3x256xf32>
    %c0_75 = arith.constant 0 : index
    %c0_76 = arith.constant 0 : index
    %101 = vector.load %arg8[%c0_75, %c0_76] : memref<3x256xf32, #tpu.memory_space<vmem>>, vector<3x256xf32>
    tpu.vector_store %arg8[%c0_75, %c0_76], %100 {strides = array<i32>} : memref<3x256xf32, #tpu.memory_space<vmem>>, vector<3x256xf32>,
    return
  }
  func.func @transform_0(%arg0: i32) -> (i32, i32) {
    %c0_i32 = arith.constant 0 : i32
    %c0_i32_0 = arith.constant 0 : i32
    return %c0_i32, %arg0 : i32, i32
  }
  func.func @transform_1(%arg0: i32) -> (i32, i32) {
    %c0_i32 = arith.constant 0 : i32
    %c0_i32_0 = arith.constant 0 : i32
    %c0_i32_1 = arith.constant 0 : i32
    return %c0_i32, %c0_i32_0 : i32, i32
  }
  func.func @transform_2(%arg0: i32) -> (i32, i32) {
    %c0_i32 = arith.constant 0 : i32
    %c0_i32_0 = arith.constant 0 : i32
    %c0_i32_1 = arith.constant 0 : i32
    return %c0_i32, %c0_i32_0 : i32, i32
  }
  func.func @transform_3(%arg0: i32) -> (i32, i32, i32) {
    %c0_i32 = arith.constant 0 : i32
    %c0_i32_0 = arith.constant 0 : i32
    %c0_i32_1 = arith.constant 0 : i32
    %c0_i32_2 = arith.constant 0 : i32
    return %c0_i32, %c0_i32_0, %c0_i32_1 : i32, i32, i32
  }
  func.func @transform_4(%arg0: i32) -> (i32, i32, i32) {
    %c0_i32 = arith.constant 0 : i32
    %c0_i32_0 = arith.constant 0 : i32
    %c0_i32_1 = arith.constant 0 : i32
    %c0_i32_2 = arith.constant 0 : i32
    return %c0_i32, %c0_i32_0, %c0_i32_1 : i32, i32, i32
  }
  func.func @transform_5(%arg0: i32) -> (i32, i32) {
    %c0_i32 = arith.constant 0 : i32
    %c0_i32_0 = arith.constant 0 : i32
    %c0_i32_1 = arith.constant 0 : i32
    return %c0_i32, %c0_i32_0 : i32, i32
  }
  func.func @transform_6(%arg0: i32) -> (i32, i32) {
    %c0_i32 = arith.constant 0 : i32
    %c0_i32_0 = arith.constant 0 : i32
    %c0_i32_1 = arith.constant 0 : i32
    return %c0_i32, %c0_i32_0 : i32, i32
  }
  func.func @transform_7(%arg0: i32) -> (i32, i32) {
    %c0_i32 = arith.constant 0 : i32
    %c0_i32_0 = arith.constant 0 : i32
    return %c0_i32, %arg0 : i32, i32
  }
}

</mosaic_0001>

<bundles_post_ra>
// kernel: param_net_forward.1
= control target key start
LH: loop header
LB: loop body
LE: loop exit
PB: predicated region body
PF: predicated region fallthrough
CT: control target
= control target key end

     0   :  { %s2031_s24 = smov 0   ;;  %s2374_s0 = inlined_call_operand.vmem [shape: f32[1,512], index: 0, kind: input, shape index: {}]   ;;  %s2375_s1 = inlined_call_operand.vmem [shape: f32[32,1], index: 1, kind: input, shape index: {}]   ;;  %s2376_s2 = inlined_call_operand.vmem [shape: f32[32,1], index: 2, kind: input, shape index: {}]   ;;  %s2377_s3 = inlined_call_operand.vmem [shape: f32[9,32,32], index: 3, kind: input, shape index: {}]   ;;  %s2378_s4 = inlined_call_operand.vmem [shape: f32[9,32,1], index: 4, kind: input, shape index: {}]   ;;  %s2379_s5 = inlined_call_operand.vmem [shape: f32[3,32], index: 5, kind: input, shape index: {}]   ;;  %s2380_s6 = inlined_call_operand.vmem [shape: f32[3,1], index: 6, kind: input, shape index: {}]   ;;  %s2381_s7 = inlined_call_operand.vmem [shape: f32[3,512], index: 7, kind: output, shape index: {}]  }
   0x1 LB: > { %s1764_s25 = sadd.s32 4294967295, %s1987_s24   ;;  %p1768_p0 = scmp.ge.s32.totalorder %s1987_s24, 1  ;;  %s1987_s24 = sphi %s2031_s24, %s17_s24  }
   0x2   : > { %p237_p1 = scmp.lt.s32.totalorder %s1987_s24, 3 }
   0x4   : > { %p238_p2 = pnand %p1768_p0, %p237_p1 }
   0x5   : > { %v323_v0 = vld [vmem:[%s2376_s2] sm:$0xff] (!%p238_p2)  ;;  %v1989_v2 = vmov (!%p238_p2), 0   ;;  %v324_v3 = vld [vmem:[%s2376_s2 + $0x8] sm:$0xff] (!%p238_p2)  ;;  %v283_v5 = vld [vmem:[%s2375_s1 + $0x18] sm:$0xff] (!%p238_p2)  ;;  %v1990_v15 = vmov (!%p238_p2), 0.0   ;;  %s1769_s9 = sshll.u32 (!%p238_p2), %s1764_s25, 1  ;;  %v305_v47 = vlaneseq (!%p238_p2) }
   0x6   : > { %241 = sbr.rel (%p238_p2) target bundleno = 2512 (0x9d0), region = 48  ;;  %v280_v1 = vld [vmem:[%s2375_s1] sm:$0xff] (!%p238_p2)  ;;  %1972 = vset.pattern.permute.xlu1 (!%p238_p2), %v1989_v2  ;;  %1971 = vset.pattern.permute.xlu0 (!%p238_p2), %v1989_v2  ;;  %v281_v4 = vld [vmem:[%s2375_s1 + $0x8] sm:$0xff] (!%p238_p2)  ;;  %v282_v6 = vld [vmem:[%s2375_s1 + $0x10] sm:$0xff] (!%p238_p2)  ;;  %p269_p3 = scmp.lt.s32.totalorder (!%p238_p2), %s1769_s9, 3  ;;  %vm391_vm0 = vcmask (!%p238_p2), 261120  }
   0x7   : > { %329 = vperm.xlu1 (!%p238_p2), %1972, %v323_v0   ;;  %286 = vperm.xlu0 (!%p238_p2), %1971, %v280_v1   ;;  %v326_v7 = vld [vmem:[%s2376_s2 + $0x18] sm:$0xff] (!%p238_p2)  ;;  %v325_v8 = vld [vmem:[%s2376_s2 + $0x10] sm:$0xff] (!%p238_p2)  ;;  %v368_v9 = vld [vmem:[%s2378_s4 + $0x8] sm:$0xff] (!%p238_p2)  ;;  %v306_v48 = vshrl.u32 (!%p238_p2), %v305_v47, 7 }
   0x8   : > { %v367_v10 = vld [vmem:[%s2378_s4] sm:$0xff] (!%p238_p2)  ;;  %v370_v11 = vld [vmem:[%s2378_s4 + $0x18] sm:$0xff] (!%p238_p2)  ;;  %v369_v12 = vld [vmem:[%s2378_s4 + $0x10] sm:$0xff] (!%p238_p2)  ;;  %468 = vmatprep.mubr.f32.mxu0 (!%p238_p2), %v1990_v15  ;;  %480 = vmatprep.mubr.f32.mxu1 (!%p238_p2), %v1990_v15 }
   0x9   : > { %v1781_v13 = vld [vmem:[%s2378_s4 + $0x28] sm:$0xff] (!%p238_p2)  ;;  %v1780_v14 = vld [vmem:[%s2378_s4 + $0x20] sm:$0xff] (!%p238_p2)  ;;  %v1783_v16 = vld [vmem:[%s2378_s4 + $0x38] sm:$0xff] (!%p238_p2)  ;;  %v307_v49 = vsub.s32 (!%p238_p2), 0, %v306_v48  ;;  %v311_v50 = vsub.s32 (!%p238_p2), 1, %v306_v48 }
   0xa   : > { %v1782_v17 = vld [vmem:[%s2378_s4 + $0x30] sm:$0xff] (!%p238_p2)  ;;  %v1793_v18 = vld [vmem:[%s2378_s4 + $0x48] sm:$0xff] (!%p238_p2)  ;;  %v1792_v19 = vld [vmem:[%s2378_s4 + $0x40] sm:$0xff] (!%p238_p2) }
   0xb   : > { %334 = vperm.xlu1 (!%p238_p2), %1972, %v324_v3   ;;  %291 = vperm.xlu0 (!%p238_p2), %1971, %v281_v4   ;;  %v1795_v20 = vld [vmem:[%s2378_s4 + $0x58] sm:$0xff] (!%p238_p2)  ;;  %v1794_v21 = vld [vmem:[%s2378_s4 + $0x50] sm:$0xff] (!%p238_p2)  ;;  %v1805_v22 = vld [vmem:[%s2378_s4 + $0x68] sm:$0xff] (!%p238_p2) }
   0xc   : > { %v1804_v23 = vld [vmem:[%s2378_s4 + $0x60] sm:$0xff] (!%p238_p2)  ;;  %v1807_v24 = vld [vmem:[%s2378_s4 + $0x78] sm:$0xff] (!%p238_p2)  ;;  %v1806_v25 = vld [vmem:[%s2378_s4 + $0x70] sm:$0xff] (!%p238_p2) }
   0xd   : > { %v1817_v26 = vld [vmem:[%s2378_s4 + $0x88] sm:$0xff]  ;;  %v1816_v27 = vld [vmem:[%s2378_s4 + $0x80] sm:$0xff]  ;;  %v1819_v28 = vld [vmem:[%s2378_s4 + $0x98] sm:$0xff]  ;;  %s2383_s9 = smov (!%p269_p3, %s1769_s9), 3 }
   0xe   : > { %v1818_v29 = vld [vmem:[%s2378_s4 + $0x90] sm:$0xff]  ;;  %v1829_v30 = vld [vmem:[%s2378_s4 + $0xa8] sm:$0xff]  ;;  %v1828_v31 = vld [vmem:[%s2378_s4 + $0xa0] sm:$0xff]  ;;  %s271_s12 = scalar_lea.vmem %s2374_s0, %s2383_s9  ;;  %s1771_s23 = sshll.u32 %s2383_s9, 2 }
   0xf   : > { %301 = vperm.xlu1 %1972, %v283_v5   ;;  %296 = vperm.xlu0 %1971, %v282_v6   ;;  %v1831_v32 = vld [vmem:[%s2378_s4 + $0xb8] sm:$0xff]  ;;  %v1830_v33 = vld [vmem:[%s2378_s4 + $0xb0] sm:$0xff]  ;;  %v1841_v34 = vld [vmem:[%s2378_s4 + $0xc8] sm:$0xff]  ;;  %s277_s28 = scalar_lea.vmem %s2381_s7, %s1771_s23 }
  0x10   : > { %v1840_v35 = vld [vmem:[%s2378_s4 + $0xc0] sm:$0xff]  ;;  %v1843_v36 = vld [vmem:[%s2378_s4 + $0xd8] sm:$0xff]  ;;  %v1842_v37 = vld [vmem:[%s2378_s4 + $0xd0] sm:$0xff] }
  0x11   : > { %v1853_v38 = vld [vmem:[%s2378_s4 + $0xe8] sm:$0xff]  ;;  %v1852_v39 = vld [vmem:[%s2378_s4 + $0xe0] sm:$0xff]  ;;  %v1855_v40 = vld [vmem:[%s2378_s4 + $0xf8] sm:$0xff] }
  0x12   : > { %v1854_v41 = vld [vmem:[%s2378_s4 + $0xf0] sm:$0xff]  ;;  %v1865_v42 = vld [vmem:[%s2378_s4 + $0x108] sm:$0xff]  ;;  %v1864_v43 = vld [vmem:[%s2378_s4 + $0x100] sm:$0xff] }
  0x13   : > { %344 = vperm.xlu1 %1972, %v326_v7   ;;  %339 = vperm.xlu0 %1971, %v325_v8   ;;  %v1867_v44 = vld [vmem:[%s2378_s4 + $0x118] sm:$0xff]  ;;  %v1866_v45 = vld [vmem:[%s2378_s4 + $0x110] sm:$0xff]  ;;  %v1614_v46 = vld [vmem:[%s2380_s6] sm:$0x7] }
  0x14   : > { %v279_v51 = vld [vmem:[%s271_s12] sm:$0x3] }
  0x15   : > { %v308_v52 = vrot.slane %v279_v51, %v307_v49  ;;  %v312_v53 = vrot.slane %v279_v51, %v311_v50 }
  0x17   : > { %378 = vperm.xlu1 %1972, %v368_v9   ;;  %373 = vperm.xlu0 %1971, %v367_v10  }
  0x1b   : > { %388 = vperm.xlu1 %1972, %v370_v11   ;;  %383 = vperm.xlu0 %1971, %v369_v12  }
  0x1f   : > { %518 = vperm.xlu1 %1972, %v1781_v13   ;;  %513 = vperm.xlu0 %1971, %v1780_v14  }
  0x23   : > { %528 = vperm.xlu1 %1972, %v1783_v16   ;;  %523 = vperm.xlu0 %1971, %v1782_v17  }
  0x27   : > { %657 = vperm.xlu1 %1972, %v1793_v18   ;;  %652 = vperm.xlu0 %1971, %v1792_v19  }
  0x2b   : > { %667 = vperm.xlu1 %1972, %v1795_v20   ;;  %662 = vperm.xlu0 %1971, %v1794_v21  }
  0x2f   : > { %796 = vperm.xlu1 %1972, %v1805_v22   ;;  %791 = vperm.xlu0 %1971, %v1804_v23  }
  0x33   : > { %806 = vperm.xlu1 %1972, %v1807_v24   ;;  %801 = vperm.xlu0 %1971, %v1806_v25  }
  0x37   : > { %935 = vperm.xlu1 %1972, %v1817_v26   ;;  %930 = vperm.xlu0 %1971, %v1816_v27   ;;  %v363_v27 = vld [vmem:[%s2377_s3] sm:$0xff] }
  0x3b   : > { %945 = vperm.xlu1 %1972, %v1819_v28   ;;  %940 = vperm.xlu0 %1971, %v1818_v29   ;;  %v365_v28 = vld [vmem:[%s2377_s3 + $0x10] sm:$0xff]  ;;  %v364_v29 = vld [vmem:[%s2377_s3 + $0x8] sm:$0xff] }
  0x3f   : > { %1074 = vperm.xlu1 %1972, %v1829_v30   ;;  %1069 = vperm.xlu0 %1971, %v1828_v31   ;;  %v366_v30 = vld [vmem:[%s2377_s3 + $0x18] sm:$0xff] }
  0x43   : > { %1084 = vperm.xlu1 %1972, %v1831_v32   ;;  %1079 = vperm.xlu0 %1971, %v1830_v33  }
  0x47   : > { %1213 = vperm.xlu1 %1972, %v1841_v34   ;;  %1208 = vperm.xlu0 %1971, %v1840_v35  }
  0x4b   : > { %1223 = vperm.xlu1 %1972, %v1843_v36   ;;  %1218 = vperm.xlu0 %1971, %v1842_v37  }
  0x4f   : > { %1352 = vperm.xlu1 %1972, %v1853_v38   ;;  %1347 = vperm.xlu0 %1971, %v1852_v39  }
  0x53   : > { %1362 = vperm.xlu1 %1972, %v1855_v40   ;;  %1357 = vperm.xlu0 %1971, %v1854_v41  }
  0x57   : > { %1491 = vperm.xlu1 %1972, %v1865_v42   ;;  %1486 = vperm.xlu0 %1971, %v1864_v43  }
  0x5b   : > { %1501 = vperm.xlu1 %1972, %v1867_v44   ;;  %1496 = vperm.xlu0 %1971, %v1866_v45  }
  0x5f   : > { %1617 = vperm.xlu0 %1971, %v1614_v46  }
  0x86   : > { %v330_v54 = vpop.permute.xlu1 %329  ;;  %v287_v55 = vpop.permute.xlu0 %286 }
  0x87   : > { %v315_v56 = vmul.f32 %v308_v52, %v287_v55  ;;  %v316_v57 = vmul.f32 %v312_v53, %v287_v55 }
  0x89   : > { %v347_v62 = vadd.f32 %v330_v54, %v315_v56  ;;  %v348_v63 = vadd.f32 %v330_v54, %v316_v57 }
  0x8a   : > { %v335_v58 = vpop.permute.xlu1 %334  ;;  %v292_v59 = vpop.permute.xlu0 %291 }
  0x8b   : > { %v317_v60 = vmul.f32 %v308_v52, %v292_v59  ;;  %v318_v61 = vmul.f32 %v312_v53, %v292_v59  ;;  %v356_v4 = vmax.f32 %v348_v63, 0.0  ;;  %v355_v6 = vmax.f32 %v347_v62, 0.0  ;;  %v1776_v63 = vld [vmem:[%s2377_s3 + $0x20] sm:$0xff] }
  0x8d   : > { %v349_v0 = vadd.f32 %v335_v58, %v317_v60  ;;  %v350_v1 = vadd.f32 %v335_v58, %v318_v61 }
  0x8e   : > { %v302_v2 = vpop.permute.xlu1 %301  ;;  %v297_v3 = vpop.permute.xlu0 %296 }
  0x8f   : > { %v358_v5 = vmax.f32 %v350_v1, 0.0  ;;  %v357_v7 = vmax.f32 %v349_v0, 0.0  ;;  %v321_v8 = vmul.f32 %v308_v52, %v302_v2  ;;  %v322_v9 = vmul.f32 %v312_v53, %v302_v2  ;;  %v1777_v0 = vld [vmem:[%s2377_s3 + $0x28] sm:$0xff]  ;;  %v1778_v1 = vld [vmem:[%s2377_s3 + $0x30] sm:$0xff]  ;;  %v1779_v2 = vld [vmem:[%s2377_s3 + $0x38] sm:$0xff] }
  0x90   : > { %v319_v10 = vmul.f32 %v308_v52, %v297_v3  ;;  %v320_v11 = vmul.f32 %v312_v53, %v297_v3 }
  0x91   : > { %v1877_v14 = vpack.c.bf16 %v358_v5, %v356_v4  ;;  %v1879_v16 = vpack.c.bf16 %v357_v7, %v355_v6 }
  0x92   : > { %v345_v12 = vpop.permute.xlu1 %344  ;;  %v340_v13 = vpop.permute.xlu0 %339 }
  0x93   : > { %v353_v17 = vadd.f32 %v345_v12, %v321_v8  ;;  %v354_v18 = vadd.f32 %v345_v12, %v322_v9  ;;  %v351_v19 = vadd.f32 %v340_v13, %v319_v10  ;;  %v352_v20 = vadd.f32 %v340_v13, %v320_v11  ;;  %1878 = vmatprep.subr.bf16.mxu0 %v1877_v14 }
  0x94   : > { %1957 = vmatprep.subr.bf16.mxu1 %v1877_v14  ;;  %1880 = vmatpush1.bf16.msra.mxu0 %v1879_v16 }
  0x95   : > { %v361_v21 = vmax.f32 %v353_v17, 0.0  ;;  %v362_v22 = vmax.f32 %v354_v18, 0.0  ;;  %v359_v23 = vmax.f32 %v351_v19, 0.0  ;;  %v360_v24 = vmax.f32 %v352_v20, 0.0  ;;  %1959 = vmatpush1.bf16.msra.mxu1 %v1879_v16 }
  0x96   : > { %v374_v31 = vpop.permute.xlu0 %373  ;;  %v379_v32 = vpop.permute.xlu1 %378 }
  0x97   : > { %v1881_v25 = vpack.c.bf16 %v362_v22, %v360_v24  ;;  %v1883_v26 = vpack.c.bf16 %v361_v21, %v359_v23 }
  0x99   : > { %1882 = vmatprep.subr.bf16.mxu0 %v1881_v25  ;;  %1958 = vmatprep.subr.bf16.mxu1 %v1881_v25 }
  0x9a   : > { %1884 = vmatpush1.bf16.msra.mxu0 %v1883_v26  ;;  %1960 = vmatpush1.bf16.msra.mxu1 %v1883_v26  ;;  %v384_v37 = vpop.permute.xlu0 %383  ;;  %v389_v38 = vpop.permute.xlu1 %388 }
  0x9d   : > { %1772 = vmatmul.mubr.msk.f32.vlgmr.msra.gmra.mrb[0].mxu0 %vm391_vm0, %v363_v27  ;;  %1774 = vmatmul.mubr.msk.f32.vlgmr.msra.gmra.mrb[0].mxu1 %vm391_vm0, %v365_v28 }
  0x9e   : > { %474 = vmatprep.mubr.f32.mxu0 %v1990_v15  ;;  %486 = vmatprep.mubr.f32.mxu1 %v1990_v15  ;;  %v514_v5 = vpop.permute.xlu0 %513  ;;  %v519_v7 = vpop.permute.xlu1 %518 }
  0xa1   : > { %1773 = vmatmul.mubr.msk.f32.gmra.mrb[2].mxu0 %vm391_vm0, %v364_v29  ;;  %1775 = vmatmul.mubr.msk.f32.gmra.mrb[2].mxu1 %vm391_vm0, %v366_v30 }
  0xa2   : > { %607 = vmatprep.mubr.f32.mxu1 %v1990_v15  ;;  %746 = vmatprep.mubr.f32.mxu0 %v1990_v15  ;;  %v524_v21 = vpop.permute.xlu0 %523  ;;  %v529_v24 = vpop.permute.xlu1 %528 }
 0x170   : > { %v470_v33 = vpop.f32.mrb[0].mxu0  ;;  %v482_v34 = vpop.f32.mrb[0].mxu1 }
 0x171   : > { %v472_v35 = vpop.f32.mrb[1].mxu0  ;;  %v484_v36 = vpop.f32.mrb[1].mxu1  ;;  %v471_v39 = vadd.f32 %v470_v33, %v374_v31  ;;  %v483_v40 = vadd.f32 %v482_v34, %v384_v37 }
 0x172   : > { %v473_v41 = vadd.f32 %v472_v35, %v374_v31  ;;  %v485_v42 = vadd.f32 %v484_v36, %v384_v37  ;;  %v1788_v36 = vld [vmem:[%s2377_s3 + $0x40] sm:$0xff]  ;;  %v1789_v37 = vld [vmem:[%s2377_s3 + $0x48] sm:$0xff] }
 0x173   : > { %v493_v51 = vmax.f32 %v471_v39, 0.0  ;;  %v497_v52 = vmax.f32 %v483_v40, 0.0  ;;  %v1791_v39 = vld [vmem:[%s2377_s3 + $0x58] sm:$0xff] }
 0x174   : > { %v476_v43 = vpop.f32.mrb[2].mxu0  ;;  %v488_v44 = vpop.f32.mrb[2].mxu1  ;;  %v494_v55 = vmax.f32 %v473_v41, 0.0  ;;  %v498_v56 = vmax.f32 %v485_v42, 0.0 }
 0x175   : > { %v477_v45 = vadd.f32 %v476_v43, %v379_v32  ;;  %v489_v46 = vadd.f32 %v488_v44, %v389_v38  ;;  %v478_v47 = vpop.f32.mrb[3].mxu0  ;;  %v490_v48 = vpop.f32.mrb[3].mxu1 }
 0x176   : > { %v479_v49 = vadd.f32 %v478_v47, %v379_v32  ;;  %v491_v50 = vadd.f32 %v490_v48, %v389_v38  ;;  %v1790_v38 = vld [vmem:[%s2377_s3 + $0x50] sm:$0xff]  ;;  %v653_v42 = vpop.permute.xlu0 %652  ;;  %v658_v44 = vpop.permute.xlu1 %657 }
 0x177   : > { %v495_v53 = vmax.f32 %v477_v45, 0.0  ;;  %v499_v54 = vmax.f32 %v489_v46, 0.0 }
 0x178   : > { %v496_v57 = vmax.f32 %v479_v49, 0.0  ;;  %v500_v58 = vmax.f32 %v491_v50, 0.0 }
 0x179   : > { %v1887_v59 = vpack.c.bf16 %v495_v53, %v493_v51  ;;  %v1891_v60 = vpack.c.bf16 %v499_v54, %v497_v52 }
 0x17a   : > { %v1885_v61 = vpack.c.bf16 %v496_v57, %v494_v55  ;;  %v1889_v62 = vpack.c.bf16 %v500_v58, %v498_v56  ;;  %v663_v57 = vpop.permute.xlu0 %662 }
 0x17c   : > { %1886 = vmatprep.subr.bf16.mxu1 %v1885_v61 }
 0x17d   : > { %1888 = vmatpush1.bf16.msra.mxu1 %v1887_v59 }
 0x17e   : > { %1890 = vmatprep.subr.bf16.mxu1 %v1889_v62 }
 0x181   : > { %1892 = vmatpush1.bf16.msra.mxu1 %v1891_v60  ;;  %v668_v60 = vpop.permute.xlu1 %667 }
 0x184   : > { %1784 = vmatmul.mubr.msk.f32.vlgmr.msra.gmra.mrb[4].mxu1 %vm391_vm0, %v1776_v63 }
 0x185   : > { %613 = vmatprep.mubr.f32.mxu1 %v1990_v15 }
 0x188   : > { %1785 = vmatmul.mubr.msk.f32.gmra.mrb[6].mxu1 %vm391_vm0, %v1777_v0 }
 0x189   : > { %619 = vmatprep.mubr.f32.mxu1 %v1990_v15 }
 0x18c   : > { %1786 = vmatmul.mubr.msk.f32.gmra.mrb[8].mxu1 %vm391_vm0, %v1778_v1 }
 0x18d   : > { %625 = vmatprep.mubr.f32.mxu1 %v1990_v15 }
 0x190   : > { %1787 = vmatmul.mubr.msk.f32.gmra.mrb[10].mxu1 %vm391_vm0, %v1779_v2 }
 0x191   : > { %885 = vmatprep.mubr.f32.mxu1 %v1990_v15 }
 0x257   : > { %v609_v3 = vpop.f32.mrb[4].mxu1 }
 0x258   : > { %v611_v4 = vpop.f32.mrb[5].mxu1  ;;  %v610_v6 = vadd.f32 %v609_v3, %v514_v5 }
 0x259   : > { %v612_v8 = vadd.f32 %v611_v4, %v514_v5 }
 0x25a   : > { %v632_v13 = vmax.f32 %v610_v6, 0.0 }
 0x25b   : > { %v615_v9 = vpop.f32.mrb[6].mxu1  ;;  %v633_v16 = vmax.f32 %v612_v8, 0.0  ;;  %v1800_v8 = vld [vmem:[%s2377_s3 + $0x60] sm:$0xff] }
 0x25c   : > { %v616_v10 = vadd.f32 %v615_v9, %v519_v7  ;;  %v617_v11 = vpop.f32.mrb[7].mxu1  ;;  %v1801_v9 = vld [vmem:[%s2377_s3 + $0x68] sm:$0xff] }
 0x25d   : > { %v618_v12 = vadd.f32 %v617_v11, %v519_v7  ;;  %v1803_v11 = vld [vmem:[%s2377_s3 + $0x78] sm:$0xff] }
 0x25e   : > { %v634_v14 = vmax.f32 %v616_v10, 0.0  ;;  %v1802_v10 = vld [vmem:[%s2377_s3 + $0x70] sm:$0xff] }
 0x25f   : > { %v635_v17 = vmax.f32 %v618_v12, 0.0  ;;  %v621_v18 = vpop.f32.mrb[8].mxu1 }
 0x260   : > { %v1895_v19 = vpack.c.bf16 %v634_v14, %v632_v13  ;;  %v623_v20 = vpop.f32.mrb[9].mxu1  ;;  %v622_v23 = vadd.f32 %v621_v18, %v524_v21  ;;  %v792_v14 = vpop.permute.xlu0 %791 }
 0x261   : > { %v1893_v22 = vpack.c.bf16 %v635_v17, %v633_v16  ;;  %v624_v25 = vadd.f32 %v623_v20, %v524_v21  ;;  %v797_v17 = vpop.permute.xlu1 %796 }
 0x262   : > { %v636_v30 = vmax.f32 %v622_v23, 0.0 }
 0x263   : > { %v627_v26 = vpop.f32.mrb[10].mxu1  ;;  %1894 = vmatprep.subr.bf16.mxu0 %v1893_v22  ;;  %v637_v32 = vmax.f32 %v624_v25, 0.0 }
 0x264   : > { %v628_v27 = vadd.f32 %v627_v26, %v529_v24  ;;  %v629_v28 = vpop.f32.mrb[11].mxu1  ;;  %1896 = vmatpush1.bf16.msra.mxu0 %v1895_v19 }
 0x265   : > { %v630_v29 = vadd.f32 %v629_v28, %v529_v24 }
 0x266   : > { %v638_v31 = vmax.f32 %v628_v27, 0.0 }
 0x267   : > { %v639_v33 = vmax.f32 %v630_v29, 0.0 }
 0x268   : > { %v1899_v34 = vpack.c.bf16 %v638_v31, %v636_v30  ;;  %v802_v30 = vpop.permute.xlu0 %801 }
 0x269   : > { %v1897_v35 = vpack.c.bf16 %v639_v33, %v637_v32  ;;  %v807_v33 = vpop.permute.xlu1 %806 }
 0x26b   : > { %1898 = vmatprep.subr.bf16.mxu0 %v1897_v35 }
 0x26c   : > { %1900 = vmatpush1.bf16.msra.mxu0 %v1899_v34 }
 0x26f   : > { %1796 = vmatmul.mubr.msk.f32.vlgmr.msra.gmra.mrb[4].mxu0 %vm391_vm0, %v1788_v36 }
 0x270   : > { %752 = vmatprep.mubr.f32.mxu0 %v1990_v15 }
 0x273   : > { %1797 = vmatmul.mubr.msk.f32.gmra.mrb[6].mxu0 %vm391_vm0, %v1789_v37 }
 0x274   : > { %758 = vmatprep.mubr.f32.mxu0 %v1990_v15 }
 0x277   : > { %1798 = vmatmul.mubr.msk.f32.gmra.mrb[8].mxu0 %vm391_vm0, %v1790_v38 }
 0x278   : > { %764 = vmatprep.mubr.f32.mxu0 %v1990_v15 }
 0x27b   : > { %1799 = vmatmul.mubr.msk.f32.gmra.mrb[10].mxu0 %vm391_vm0, %v1791_v39 }
 0x27c   : > { %1024 = vmatprep.mubr.f32.mxu0 %v1990_v15 }
 0x342   : > { %v748_v40 = vpop.f32.mrb[4].mxu0 }
 0x343   : > { %v750_v41 = vpop.f32.mrb[5].mxu0  ;;  %v749_v43 = vadd.f32 %v748_v40, %v653_v42 }
 0x344   : > { %v751_v45 = vadd.f32 %v750_v41, %v653_v42 }
 0x345   : > { %v771_v50 = vmax.f32 %v749_v43, 0.0 }
 0x346   : > { %v754_v46 = vpop.f32.mrb[6].mxu0  ;;  %v772_v52 = vmax.f32 %v751_v45, 0.0  ;;  %v1812_v45 = vld [vmem:[%s2377_s3 + $0x80] sm:$0xff] }
 0x347   : > { %v755_v47 = vadd.f32 %v754_v46, %v658_v44  ;;  %v756_v48 = vpop.f32.mrb[7].mxu0  ;;  %v1813_v46 = vld [vmem:[%s2377_s3 + $0x88] sm:$0xff] }
 0x348   : > { %v757_v49 = vadd.f32 %v756_v48, %v658_v44  ;;  %v1815_v48 = vld [vmem:[%s2377_s3 + $0x98] sm:$0xff] }
 0x349   : > { %v773_v51 = vmax.f32 %v755_v47, 0.0  ;;  %v1814_v47 = vld [vmem:[%s2377_s3 + $0x90] sm:$0xff] }
 0x34a   : > { %v774_v53 = vmax.f32 %v757_v49, 0.0  ;;  %v760_v54 = vpop.f32.mrb[8].mxu0 }
 0x34b   : > { %v1903_v55 = vpack.c.bf16 %v773_v51, %v771_v50  ;;  %v762_v56 = vpop.f32.mrb[9].mxu0  ;;  %v761_v59 = vadd.f32 %v760_v54, %v663_v57  ;;  %v931_v51 = vpop.permute.xlu0 %930 }
 0x34c   : > { %v1901_v58 = vpack.c.bf16 %v774_v53, %v772_v52  ;;  %v763_v61 = vadd.f32 %v762_v56, %v663_v57  ;;  %v936_v53 = vpop.permute.xlu1 %935 }
 0x34d   : > { %v775_v2 = vmax.f32 %v761_v59, 0.0 }
 0x34e   : > { %v766_v62 = vpop.f32.mrb[10].mxu0  ;;  %1902 = vmatprep.subr.bf16.mxu1 %v1901_v58  ;;  %v776_v4 = vmax.f32 %v763_v61, 0.0 }
 0x34f   : > { %v767_v63 = vadd.f32 %v766_v62, %v668_v60  ;;  %v768_v0 = vpop.f32.mrb[11].mxu0  ;;  %1904 = vmatpush1.bf16.msra.mxu1 %v1903_v55 }
 0x350   : > { %v769_v1 = vadd.f32 %v768_v0, %v668_v60 }
 0x351   : > { %v777_v3 = vmax.f32 %v767_v63, 0.0 }
 0x352   : > { %v778_v5 = vmax.f32 %v769_v1, 0.0 }
 0x353   : > { %v1907_v6 = vpack.c.bf16 %v777_v3, %v775_v2  ;;  %v941_v2 = vpop.permute.xlu0 %940 }
 0x354   : > { %v1905_v7 = vpack.c.bf16 %v778_v5, %v776_v4  ;;  %v946_v5 = vpop.permute.xlu1 %945 }
 0x356   : > { %1906 = vmatprep.subr.bf16.mxu1 %v1905_v7 }
 0x357   : > { %1908 = vmatpush1.bf16.msra.mxu1 %v1907_v6 }
 0x35a   : > { %1808 = vmatmul.mubr.msk.f32.vlgmr.msra.gmra.mrb[12].mxu1 %vm391_vm0, %v1800_v8 }
 0x35b   : > { %891 = vmatprep.mubr.f32.mxu1 %v1990_v15 }
 0x35e   : > { %1809 = vmatmul.mubr.msk.f32.gmra.mrb[14].mxu1 %vm391_vm0, %v1801_v9 }
 0x35f   : > { %897 = vmatprep.mubr.f32.mxu1 %v1990_v15 }
 0x362   : > { %1810 = vmatmul.mubr.msk.f32.gmra.mrb[16].mxu1 %vm391_vm0, %v1802_v10 }
 0x363   : > { %903 = vmatprep.mubr.f32.mxu1 %v1990_v15 }
 0x366   : > { %1811 = vmatmul.mubr.msk.f32.gmra.mrb[18].mxu1 %vm391_vm0, %v1803_v11 }
 0x367   : > { %1163 = vmatprep.mubr.f32.mxu1 %v1990_v15 }
 0x42d   : > { %v887_v12 = vpop.f32.mrb[12].mxu1 }
 0x42e   : > { %v889_v13 = vpop.f32.mrb[13].mxu1  ;;  %v888_v16 = vadd.f32 %v887_v12, %v792_v14 }
 0x42f   : > { %v890_v18 = vadd.f32 %v889_v13, %v792_v14 }
 0x430   : > { %v910_v23 = vmax.f32 %v888_v16, 0.0 }
 0x431   : > { %v893_v19 = vpop.f32.mrb[14].mxu1  ;;  %v911_v25 = vmax.f32 %v890_v18, 0.0  ;;  %v1824_v18 = vld [vmem:[%s2377_s3 + $0xa0] sm:$0xff] }
 0x432   : > { %v894_v20 = vadd.f32 %v893_v19, %v797_v17  ;;  %v895_v21 = vpop.f32.mrb[15].mxu1  ;;  %v1825_v19 = vld [vmem:[%s2377_s3 + $0xa8] sm:$0xff] }
 0x433   : > { %v896_v22 = vadd.f32 %v895_v21, %v797_v17  ;;  %v1827_v21 = vld [vmem:[%s2377_s3 + $0xb8] sm:$0xff] }
 0x434   : > { %v912_v24 = vmax.f32 %v894_v20, 0.0  ;;  %v1826_v20 = vld [vmem:[%s2377_s3 + $0xb0] sm:$0xff] }
 0x435   : > { %v913_v26 = vmax.f32 %v896_v22, 0.0  ;;  %v899_v27 = vpop.f32.mrb[16].mxu1 }
 0x436   : > { %v1911_v28 = vpack.c.bf16 %v912_v24, %v910_v23  ;;  %v901_v29 = vpop.f32.mrb[17].mxu1  ;;  %v900_v32 = vadd.f32 %v899_v27, %v802_v30  ;;  %v1070_v24 = vpop.permute.xlu0 %1069 }
 0x437   : > { %v1909_v31 = vpack.c.bf16 %v913_v26, %v911_v25  ;;  %v902_v34 = vadd.f32 %v901_v29, %v802_v30  ;;  %v1075_v26 = vpop.permute.xlu1 %1074 }
 0x438   : > { %v914_v39 = vmax.f32 %v900_v32, 0.0 }
 0x439   : > { %v905_v35 = vpop.f32.mrb[18].mxu1  ;;  %1910 = vmatprep.subr.bf16.mxu0 %v1909_v31  ;;  %v915_v41 = vmax.f32 %v902_v34, 0.0 }
 0x43a   : > { %v906_v36 = vadd.f32 %v905_v35, %v807_v33  ;;  %v907_v37 = vpop.f32.mrb[19].mxu1  ;;  %1912 = vmatpush1.bf16.msra.mxu0 %v1911_v28 }
 0x43b   : > { %v908_v38 = vadd.f32 %v907_v37, %v807_v33 }
 0x43c   : > { %v916_v40 = vmax.f32 %v906_v36, 0.0 }
 0x43d   : > { %v917_v42 = vmax.f32 %v908_v38, 0.0 }
 0x43e   : > { %v1915_v43 = vpack.c.bf16 %v916_v40, %v914_v39  ;;  %v1080_v39 = vpop.permute.xlu0 %1079 }
 0x43f   : > { %v1913_v44 = vpack.c.bf16 %v917_v42, %v915_v41  ;;  %v1085_v42 = vpop.permute.xlu1 %1084 }
 0x441   : > { %1914 = vmatprep.subr.bf16.mxu0 %v1913_v44 }
 0x442   : > { %1916 = vmatpush1.bf16.msra.mxu0 %v1915_v43 }
 0x445   : > { %1820 = vmatmul.mubr.msk.f32.vlgmr.msra.gmra.mrb[12].mxu0 %vm391_vm0, %v1812_v45 }
 0x446   : > { %1030 = vmatprep.mubr.f32.mxu0 %v1990_v15 }
 0x449   : > { %1821 = vmatmul.mubr.msk.f32.gmra.mrb[14].mxu0 %vm391_vm0, %v1813_v46 }
 0x44a   : > { %1036 = vmatprep.mubr.f32.mxu0 %v1990_v15 }
 0x44d   : > { %1822 = vmatmul.mubr.msk.f32.gmra.mrb[16].mxu0 %vm391_vm0, %v1814_v47 }
 0x44e   : > { %1042 = vmatprep.mubr.f32.mxu0 %v1990_v15 }
 0x451   : > { %1823 = vmatmul.mubr.msk.f32.gmra.mrb[18].mxu0 %vm391_vm0, %v1815_v48 }
 0x452   : > { %1302 = vmatprep.mubr.f32.mxu0 %v1990_v15 }
 0x518   : > { %v1026_v49 = vpop.f32.mrb[12].mxu0 }
 0x519   : > { %v1028_v50 = vpop.f32.mrb[13].mxu0  ;;  %v1027_v52 = vadd.f32 %v1026_v49, %v931_v51 }
 0x51a   : > { %v1029_v54 = vadd.f32 %v1028_v50, %v931_v51 }
 0x51b   : > { %v1049_v59 = vmax.f32 %v1027_v52, 0.0 }
 0x51c   : > { %v1032_v55 = vpop.f32.mrb[14].mxu0  ;;  %v1050_v61 = vmax.f32 %v1029_v54, 0.0  ;;  %v1836_v54 = vld [vmem:[%s2377_s3 + $0xc0] sm:$0xff] }
 0x51d   : > { %v1033_v56 = vadd.f32 %v1032_v55, %v936_v53  ;;  %v1034_v57 = vpop.f32.mrb[15].mxu0  ;;  %v1837_v55 = vld [vmem:[%s2377_s3 + $0xc8] sm:$0xff] }
 0x51e   : > { %v1035_v58 = vadd.f32 %v1034_v57, %v936_v53  ;;  %v1839_v57 = vld [vmem:[%s2377_s3 + $0xd8] sm:$0xff] }
 0x51f   : > { %v1051_v60 = vmax.f32 %v1033_v56, 0.0  ;;  %v1838_v56 = vld [vmem:[%s2377_s3 + $0xd0] sm:$0xff] }
 0x520   : > { %v1052_v62 = vmax.f32 %v1035_v58, 0.0  ;;  %v1038_v63 = vpop.f32.mrb[16].mxu0 }
 0x521   : > { %v1919_v0 = vpack.c.bf16 %v1051_v60, %v1049_v59  ;;  %v1040_v1 = vpop.f32.mrb[17].mxu0  ;;  %v1039_v4 = vadd.f32 %v1038_v63, %v941_v2  ;;  %v1209_v60 = vpop.permute.xlu0 %1208 }
 0x522   : > { %v1917_v3 = vpack.c.bf16 %v1052_v62, %v1050_v61  ;;  %v1041_v6 = vadd.f32 %v1040_v1, %v941_v2  ;;  %v1214_v62 = vpop.permute.xlu1 %1213 }
 0x523   : > { %v1053_v11 = vmax.f32 %v1039_v4, 0.0 }
 0x524   : > { %v1044_v7 = vpop.f32.mrb[18].mxu0  ;;  %1918 = vmatprep.subr.bf16.mxu1 %v1917_v3  ;;  %v1054_v13 = vmax.f32 %v1041_v6, 0.0 }
 0x525   : > { %v1045_v8 = vadd.f32 %v1044_v7, %v946_v5  ;;  %v1046_v9 = vpop.f32.mrb[19].mxu0  ;;  %1920 = vmatpush1.bf16.msra.mxu1 %v1919_v0 }
 0x526   : > { %v1047_v10 = vadd.f32 %v1046_v9, %v946_v5 }
 0x527   : > { %v1055_v12 = vmax.f32 %v1045_v8, 0.0 }
 0x528   : > { %v1056_v14 = vmax.f32 %v1047_v10, 0.0 }
 0x529   : > { %v1923_v16 = vpack.c.bf16 %v1055_v12, %v1053_v11  ;;  %v1219_v11 = vpop.permute.xlu0 %1218 }
 0x52a   : > { %v1921_v17 = vpack.c.bf16 %v1056_v14, %v1054_v13  ;;  %v1224_v14 = vpop.permute.xlu1 %1223 }
 0x52c   : > { %1922 = vmatprep.subr.bf16.mxu1 %v1921_v17 }
 0x52d   : > { %1924 = vmatpush1.bf16.msra.mxu1 %v1923_v16 }
 0x530   : > { %1832 = vmatmul.mubr.msk.f32.vlgmr.msra.gmra.mrb[20].mxu1 %vm391_vm0, %v1824_v18 }
 0x531   : > { %1169 = vmatprep.mubr.f32.mxu1 %v1990_v15 }
 0x534   : > { %1833 = vmatmul.mubr.msk.f32.gmra.mrb[22].mxu1 %vm391_vm0, %v1825_v19 }
 0x535   : > { %1175 = vmatprep.mubr.f32.mxu1 %v1990_v15 }
 0x538   : > { %1834 = vmatmul.mubr.msk.f32.gmra.mrb[24].mxu1 %vm391_vm0, %v1826_v20 }
 0x539   : > { %1181 = vmatprep.mubr.f32.mxu1 %v1990_v15 }
 0x53c   : > { %1835 = vmatmul.mubr.msk.f32.gmra.mrb[26].mxu1 %vm391_vm0, %v1827_v21 }
 0x53d   : > { %1441 = vmatprep.mubr.f32.mxu1 %v1990_v15 }
 0x603   : > { %v1165_v22 = vpop.f32.mrb[20].mxu1 }
 0x604   : > { %v1167_v23 = vpop.f32.mrb[21].mxu1  ;;  %v1166_v25 = vadd.f32 %v1165_v22, %v1070_v24 }
 0x605   : > { %v1168_v27 = vadd.f32 %v1167_v23, %v1070_v24 }
 0x606   : > { %v1188_v32 = vmax.f32 %v1166_v25, 0.0 }
 0x607   : > { %v1171_v28 = vpop.f32.mrb[22].mxu1  ;;  %v1189_v34 = vmax.f32 %v1168_v27, 0.0  ;;  %v1848_v27 = vld [vmem:[%s2377_s3 + $0xe0] sm:$0xff] }
 0x608   : > { %v1172_v29 = vadd.f32 %v1171_v28, %v1075_v26  ;;  %v1173_v30 = vpop.f32.mrb[23].mxu1  ;;  %v1849_v28 = vld [vmem:[%s2377_s3 + $0xe8] sm:$0xff] }
 0x609   : > { %v1174_v31 = vadd.f32 %v1173_v30, %v1075_v26  ;;  %v1851_v30 = vld [vmem:[%s2377_s3 + $0xf8] sm:$0xff] }
 0x60a   : > { %v1190_v33 = vmax.f32 %v1172_v29, 0.0  ;;  %v1850_v29 = vld [vmem:[%s2377_s3 + $0xf0] sm:$0xff] }
 0x60b   : > { %v1191_v35 = vmax.f32 %v1174_v31, 0.0  ;;  %v1177_v36 = vpop.f32.mrb[24].mxu1 }
 0x60c   : > { %v1927_v37 = vpack.c.bf16 %v1190_v33, %v1188_v32  ;;  %v1179_v38 = vpop.f32.mrb[25].mxu1  ;;  %v1178_v41 = vadd.f32 %v1177_v36, %v1080_v39  ;;  %v1348_v33 = vpop.permute.xlu0 %1347 }
 0x60d   : > { %v1925_v40 = vpack.c.bf16 %v1191_v35, %v1189_v34  ;;  %v1180_v43 = vadd.f32 %v1179_v38, %v1080_v39  ;;  %v1353_v35 = vpop.permute.xlu1 %1352 }
 0x60e   : > { %v1192_v48 = vmax.f32 %v1178_v41, 0.0 }
 0x60f   : > { %v1183_v44 = vpop.f32.mrb[26].mxu1  ;;  %1926 = vmatprep.subr.bf16.mxu0 %v1925_v40  ;;  %v1193_v50 = vmax.f32 %v1180_v43, 0.0 }
 0x610   : > { %v1184_v45 = vadd.f32 %v1183_v44, %v1085_v42  ;;  %v1185_v46 = vpop.f32.mrb[27].mxu1  ;;  %1928 = vmatpush1.bf16.msra.mxu0 %v1927_v37 }
 0x611   : > { %v1186_v47 = vadd.f32 %v1185_v46, %v1085_v42 }
 0x612   : > { %v1194_v49 = vmax.f32 %v1184_v45, 0.0 }
 0x613   : > { %v1195_v51 = vmax.f32 %v1186_v47, 0.0 }
 0x614   : > { %v1931_v52 = vpack.c.bf16 %v1194_v49, %v1192_v48  ;;  %v1358_v48 = vpop.permute.xlu0 %1357 }
 0x615   : > { %v1929_v53 = vpack.c.bf16 %v1195_v51, %v1193_v50  ;;  %v1363_v51 = vpop.permute.xlu1 %1362 }
 0x617   : > { %1930 = vmatprep.subr.bf16.mxu0 %v1929_v53 }
 0x618   : > { %1932 = vmatpush1.bf16.msra.mxu0 %v1931_v52 }
 0x61b   : > { %1844 = vmatmul.mubr.msk.f32.vlgmr.msra.gmra.mrb[20].mxu0 %vm391_vm0, %v1836_v54 }
 0x61c   : > { %1308 = vmatprep.mubr.f32.mxu0 %v1990_v15 }
 0x61f   : > { %1845 = vmatmul.mubr.msk.f32.gmra.mrb[22].mxu0 %vm391_vm0, %v1837_v55 }
 0x620   : > { %1314 = vmatprep.mubr.f32.mxu0 %v1990_v15 }
 0x623   : > { %1846 = vmatmul.mubr.msk.f32.gmra.mrb[24].mxu0 %vm391_vm0, %v1838_v56 }
 0x624   : > { %1320 = vmatprep.mubr.f32.mxu0 %v1990_v15 }
 0x627   : > { %1847 = vmatmul.mubr.msk.f32.gmra.mrb[26].mxu0 %vm391_vm0, %v1839_v57 }
 0x628   : > { %1580 = vmatprep.mubr.f32.mxu0 %v1990_v15 }
 0x6ee   : > { %v1304_v58 = vpop.f32.mrb[20].mxu0 }
 0x6ef   : > { %v1306_v59 = vpop.f32.mrb[21].mxu0  ;;  %v1305_v61 = vadd.f32 %v1304_v58, %v1209_v60 }
 0x6f0   : > { %v1307_v63 = vadd.f32 %v1306_v59, %v1209_v60 }
 0x6f1   : > { %v1327_v4 = vmax.f32 %v1305_v61, 0.0 }
 0x6f2   : > { %v1310_v0 = vpop.f32.mrb[22].mxu0  ;;  %v1328_v6 = vmax.f32 %v1307_v63, 0.0  ;;  %v1860_v63 = vld [vmem:[%s2377_s3 + $0x100] sm:$0xff] }
 0x6f3   : > { %v1311_v1 = vadd.f32 %v1310_v0, %v1214_v62  ;;  %v1312_v2 = vpop.f32.mrb[23].mxu0  ;;  %v1861_v0 = vld [vmem:[%s2377_s3 + $0x108] sm:$0xff] }
 0x6f4   : > { %v1313_v3 = vadd.f32 %v1312_v2, %v1214_v62  ;;  %v1863_v2 = vld [vmem:[%s2377_s3 + $0x118] sm:$0xff] }
 0x6f5   : > { %v1329_v5 = vmax.f32 %v1311_v1, 0.0  ;;  %v1862_v1 = vld [vmem:[%s2377_s3 + $0x110] sm:$0xff] }
 0x6f6   : > { %v1330_v7 = vmax.f32 %v1313_v3, 0.0  ;;  %v1316_v8 = vpop.f32.mrb[24].mxu0 }
 0x6f7   : > { %v1935_v9 = vpack.c.bf16 %v1329_v5, %v1327_v4  ;;  %v1318_v10 = vpop.f32.mrb[25].mxu0  ;;  %v1317_v13 = vadd.f32 %v1316_v8, %v1219_v11  ;;  %v1487_v5 = vpop.permute.xlu0 %1486 }
 0x6f8   : > { %v1933_v12 = vpack.c.bf16 %v1330_v7, %v1328_v6  ;;  %v1319_v16 = vadd.f32 %v1318_v10, %v1219_v11  ;;  %v1492_v7 = vpop.permute.xlu1 %1491 }
 0x6f9   : > { %v1331_v21 = vmax.f32 %v1317_v13, 0.0 }
 0x6fa   : > { %v1322_v17 = vpop.f32.mrb[26].mxu0  ;;  %1934 = vmatprep.subr.bf16.mxu1 %v1933_v12  ;;  %v1332_v23 = vmax.f32 %v1319_v16, 0.0 }
 0x6fb   : > { %v1323_v18 = vadd.f32 %v1322_v17, %v1224_v14  ;;  %v1324_v19 = vpop.f32.mrb[27].mxu0  ;;  %1936 = vmatpush1.bf16.msra.mxu1 %v1935_v9 }
 0x6fc   : > { %v1325_v20 = vadd.f32 %v1324_v19, %v1224_v14 }
 0x6fd   : > { %v1333_v22 = vmax.f32 %v1323_v18, 0.0 }
 0x6fe   : > { %v1334_v24 = vmax.f32 %v1325_v20, 0.0  ;;  %v1497_v20 = vpop.permute.xlu0 %1496 }
 0x6ff   : > { %v1939_v25 = vpack.c.bf16 %v1333_v22, %v1331_v21 }
 0x700   : > { %v1937_v26 = vpack.c.bf16 %v1334_v24, %v1332_v23  ;;  %v1502_v23 = vpop.permute.xlu1 %1501 }
 0x702   : > { %1938 = vmatprep.subr.bf16.mxu1 %v1937_v26 }
 0x703   : > { %1940 = vmatpush1.bf16.msra.mxu1 %v1939_v25 }
 0x706   : > { %1856 = vmatmul.mubr.msk.f32.vlgmr.msra.gmra.mrb[28].mxu1 %vm391_vm0, %v1848_v27 }
 0x707   : > { %1447 = vmatprep.mubr.f32.mxu1 %v1990_v15 }
 0x70a   : > { %1857 = vmatmul.mubr.msk.f32.gmra.mrb[30].mxu1 %vm391_vm0, %v1849_v28 }
 0x70b   : > { %1453 = vmatprep.mubr.f32.mxu1 %v1990_v15 }
 0x70e   : > { %1858 = vmatmul.mubr.msk.f32.gmra.mrb[32].mxu1 %vm391_vm0, %v1850_v29 }
 0x70f   : > { %1459 = vmatprep.mubr.f32.mxu1 %v1990_v15 }
 0x712   : > { %1859 = vmatmul.mubr.msk.f32.gmra.mrb[34].mxu1 %vm391_vm0, %v1851_v30 }
 0x713   : > { %1687 = vmatprep.mubr.f32.mxu1 %v1990_v15 }
 0x7d9   : > { %v1443_v31 = vpop.f32.mrb[28].mxu1 }
 0x7da   : > { %v1445_v32 = vpop.f32.mrb[29].mxu1  ;;  %v1444_v34 = vadd.f32 %v1443_v31, %v1348_v33 }
 0x7db   : > { %v1446_v36 = vadd.f32 %v1445_v32, %v1348_v33 }
 0x7dc   : > { %v1466_v41 = vmax.f32 %v1444_v34, 0.0 }
 0x7dd   : > { %v1449_v37 = vpop.f32.mrb[30].mxu1  ;;  %v1467_v43 = vmax.f32 %v1446_v36, 0.0  ;;  %v1618_v36 = vpop.permute.xlu0 %1617 }
 0x7de   : > { %v1450_v38 = vadd.f32 %v1449_v37, %v1353_v35  ;;  %v1451_v39 = vpop.f32.mrb[31].mxu1 }
 0x7df   : > { %v1452_v40 = vadd.f32 %v1451_v39, %v1353_v35  ;;  %v1613_v35 = vld [vmem:[%s2379_s5] sm:$0x7] }
 0x7e0   : > { %v1468_v42 = vmax.f32 %v1450_v38, 0.0 }
 0x7e1   : > { %v1469_v44 = vmax.f32 %v1452_v40, 0.0  ;;  %v1455_v45 = vpop.f32.mrb[32].mxu1 }
 0x7e2   : > { %v1943_v46 = vpack.c.bf16 %v1468_v42, %v1466_v41  ;;  %v1457_v47 = vpop.f32.mrb[33].mxu1  ;;  %v1456_v50 = vadd.f32 %v1455_v45, %v1358_v48 }
 0x7e3   : > { %v1941_v49 = vpack.c.bf16 %v1469_v44, %v1467_v43  ;;  %v1458_v52 = vadd.f32 %v1457_v47, %v1358_v48 }
 0x7e4   : > { %v1470_v57 = vmax.f32 %v1456_v50, 0.0 }
 0x7e5   : > { %v1461_v53 = vpop.f32.mrb[34].mxu1  ;;  %1942 = vmatprep.subr.bf16.mxu0 %v1941_v49  ;;  %v1471_v59 = vmax.f32 %v1458_v52, 0.0 }
 0x7e6   : > { %v1462_v54 = vadd.f32 %v1461_v53, %v1363_v51  ;;  %v1463_v55 = vpop.f32.mrb[35].mxu1  ;;  %1944 = vmatpush1.bf16.msra.mxu0 %v1943_v46 }
 0x7e7   : > { %v1464_v56 = vadd.f32 %v1463_v55, %v1363_v51 }
 0x7e8   : > { %v1472_v58 = vmax.f32 %v1462_v54, 0.0 }
 0x7e9   : > { %v1473_v60 = vmax.f32 %v1464_v56, 0.0 }
 0x7ea   : > { %v1947_v61 = vpack.c.bf16 %v1472_v58, %v1470_v57 }
 0x7eb   : > { %v1945_v62 = vpack.c.bf16 %v1473_v60, %v1471_v59 }
 0x7ed   : > { %1946 = vmatprep.subr.bf16.mxu0 %v1945_v62 }
 0x7ee   : > { %1948 = vmatpush1.bf16.msra.mxu0 %v1947_v61 }
 0x7f1   : > { %1868 = vmatmul.mubr.msk.f32.vlgmr.msra.gmra.mrb[28].mxu0 %vm391_vm0, %v1860_v63 }
 0x7f2   : > { %1586 = vmatprep.mubr.f32.mxu0 %v1990_v15 }
 0x7f5   : > { %1869 = vmatmul.mubr.msk.f32.gmra.mrb[30].mxu0 %vm391_vm0, %v1861_v0 }
 0x7f6   : > { %1592 = vmatprep.mubr.f32.mxu0 %v1990_v15 }
 0x7f9   : > { %1870 = vmatmul.mubr.msk.f32.gmra.mrb[32].mxu0 %vm391_vm0, %v1862_v1 }
 0x7fa   : > { %1598 = vmatprep.mubr.f32.mxu0 %v1990_v15 }
 0x7fd   : > { %1871 = vmatmul.mubr.msk.f32.gmra.mrb[34].mxu0 %vm391_vm0, %v1863_v2 }
 0x8c4   : > { %v1582_v3 = vpop.f32.mrb[28].mxu0 }
 0x8c5   : > { %v1584_v4 = vpop.f32.mrb[29].mxu0  ;;  %v1583_v6 = vadd.f32 %v1582_v3, %v1487_v5 }
 0x8c6   : > { %v1585_v8 = vadd.f32 %v1584_v4, %v1487_v5 }
 0x8c7   : > { %v1605_v13 = vmax.f32 %v1583_v6, 0.0 }
 0x8c8   : > { %v1588_v9 = vpop.f32.mrb[30].mxu0  ;;  %v1606_v16 = vmax.f32 %v1585_v8, 0.0 }
 0x8c9   : > { %v1589_v10 = vadd.f32 %v1588_v9, %v1492_v7  ;;  %v1590_v11 = vpop.f32.mrb[31].mxu0 }
 0x8ca   : > { %v1591_v12 = vadd.f32 %v1590_v11, %v1492_v7 }
 0x8cb   : > { %v1607_v14 = vmax.f32 %v1589_v10, 0.0 }
 0x8cc   : > { %v1608_v15 = vmax.f32 %v1591_v12, 0.0  ;;  %v1594_v17 = vpop.f32.mrb[32].mxu0 }
 0x8cd   : > { %v1951_v18 = vpack.c.bf16 %v1607_v14, %v1605_v13  ;;  %v1596_v19 = vpop.f32.mrb[33].mxu0  ;;  %v1595_v22 = vadd.f32 %v1594_v17, %v1497_v20 }
 0x8ce   : > { %v1949_v21 = vpack.c.bf16 %v1608_v15, %v1606_v16  ;;  %v1597_v24 = vadd.f32 %v1596_v19, %v1497_v20 }
 0x8cf   : > { %v1609_v29 = vmax.f32 %v1595_v22, 0.0 }
 0x8d0   : > { %v1600_v25 = vpop.f32.mrb[34].mxu0  ;;  %1950 = vmatprep.subr.bf16.mxu1 %v1949_v21  ;;  %v1610_v31 = vmax.f32 %v1597_v24, 0.0 }
 0x8d1   : > { %v1601_v26 = vadd.f32 %v1600_v25, %v1502_v23  ;;  %v1602_v27 = vpop.f32.mrb[35].mxu0  ;;  %1952 = vmatpush1.bf16.msra.mxu1 %v1951_v18 }
 0x8d2   : > { %v1603_v28 = vadd.f32 %v1602_v27, %v1502_v23 }
 0x8d3   : > { %v1611_v30 = vmax.f32 %v1601_v26, 0.0 }
 0x8d4   : > { %v1612_v32 = vmax.f32 %v1603_v28, 0.0 }
 0x8d5   : > { %v1955_v33 = vpack.c.bf16 %v1611_v30, %v1609_v29 }
 0x8d6   : > { %v1953_v34 = vpack.c.bf16 %v1612_v32, %v1610_v31 }
 0x8d8   : > { %1954 = vmatprep.subr.bf16.mxu1 %v1953_v34 }
 0x8d9   : > { %1956 = vmatpush1.bf16.msra.mxu1 %v1955_v33 }
 0x8dc   : > { %1872 = vmatmul.mubr.msk.f32.vlgmr.msra.gmra.mrb[36].mxu1 %vm391_vm0, %v1613_v35 }
 0x9af   : > { %v1689_v37 = vpop.f32.mrb[36].mxu1 }
 0x9b0   : > { %v1690_v38 = vadd.f32 %v1689_v37, %v1618_v36  ;;  %v1691_v39 = vpop.f32.mrb[37].mxu1 }
 0x9b1   : > { %v1692_v40 = vadd.f32 %v1691_v39, %v1618_v36 }
 0x9b2   : > { %v1873_v41 = vmul.f32 -1.442695, %v1690_v38 }
 0x9b3   : > { %v1874_v42 = vmul.f32 -1.442695, %v1692_v40 }
 0x9b4   : > { %1973 = vpow2.f32 %v1873_v41 }
 0x9b5   : > { %1975 = vpow2.f32 %v1874_v42 }
 0x9be   : > { %v1974_v43 = vpop.eup %1973 }
 0x9bf   : > { %v1976_v44 = vpop.eup %1975  ;;  %v1700_v45 = vadd.f32 1.0, %v1974_v43 }
 0x9c0   : > { %v1701_v46 = vadd.f32 1.0, %v1976_v44 }
 0x9c1   : > { %1977 = vrcp.f32 %v1700_v45 }
 0x9c2   : > { %1979 = vrcp.f32 %v1701_v46 }
 0x9cb   : > { %v1978_v47 = vpop.eup %1977 }
 0x9cc   : > { %v1980_v48 = vpop.eup %1979 }
 0x9cd   : > { %v1708_v49 = vcombine.low %v1978_v47, %v1980_v48 }
 0x9cf   : > { %1710 = vst [vmem:[%s277_s28] sm:$0x77] %v1708_v49 }
 0x9d0 PF: > { %s17_s24 = sadd.s32 1, %s1987_s24  }
 0x9d1   : > { %p14_p4 = scmp.ge.s32.totalorder %s17_s24, 4  }
 0x9d3   :  { %16 = sbr.rel (!%p14_p4) target bundleno = 1 (0x1), region = 94 }

</bundles_post_ra>
